<compile_context>
chip_gen: v5e
topology: v5e:2x2
jax: 0.10.0
libtpu: 0.0.40
codegen_flags: <defaults>
</compile_context>

<pallas_src>
import jax
import jax.numpy as jnp
from jax import lax
from jax.experimental import pallas as pl
from jax.experimental.pallas import tpu as pltpu

_LANES = 128
_CHUNK_ROWS = 32                        # 4 accumulators x 8 sublanes per loop step
_ALIGN_ELEMS = _CHUNK_ROWS * _LANES     # 4096: minimal flat padding granularity
_NATIVE_DTYPES = ("float32", "bfloat16", "float16")


def _round_up(a, b):
    return (a + b - 1) // b * b


def _tpu_config():
    """(num_cores, tile_rows, vmem_limit_bytes) for the local TPU generation."""
    kind = ""
    try:
        kind = (jax.devices()[0].device_kind or "").lower()
    except Exception:
        pass
    if "v7" in kind:                    # 2 TCs, 64 MiB VMEM/TC, ~3.2 TB/s HBM
        return 2, 8192, 32 * 1024 * 1024
    if "v6" in kind:                    # 1 TC, 128 MiB VMEM, ~1.4 TB/s HBM
        return 1, 16384, 64 * 1024 * 1024
    if "v5p" in kind or "v4" in kind:   # megacore: 2 TCs per chip
        return 2, 8192, 64 * 1024 * 1024
    if "v5" in kind:                    # v5e: 1 TC, 16 MiB default scoped VMEM
        return 1, 8192, 64 * 1024 * 1024
    return 1, 8192, 32 * 1024 * 1024


def _make_mse_kernel(tile_rows, rows, bpc, inv_n, needs_mask):
    chunks = tile_rows // _CHUNK_ROWS

    def kernel(x_ref, p_ref, o_ref):
        c = pl.program_id(0)
        i = pl.program_id(1)

        # Zero this core's resident (8,128) partial-sum block on step 0.
        @pl.when(i == 0)
        def _():
            o_ref[...] = jnp.zeros_like(o_ref)

        if needs_mask:
            # Rows of this block that actually exist in the (rows,128) input;
            # fully out-of-range (surplus) blocks contribute 0.
            blk = c * bpc + i
            valid = jnp.clip(rows - blk * tile_rows, 0, tile_rows)
            row_iota = lax.broadcasted_iota(jnp.int32, (_CHUNK_ROWS, _LANES), 0)

        def chunk_body(k, accs):
            a0, a1, a2, a3 = accs
            off = pl.multiple_of(k * _CHUNK_ROWS, _CHUNK_ROWS)
            # Native-dtype tiles in HBM/VMEM; upcast per chunk on the VPU.
            xs = x_ref[pl.ds(off, _CHUNK_ROWS), :].astype(jnp.float32)
            ps = p_ref[pl.ds(off, _CHUNK_ROWS), :].astype(jnp.float32)
            d = xs - ps
            dd = d * d
            if needs_mask:
                dd = jnp.where(row_iota + off < valid, dd, 0.0)
            # Four independent accumulation chains (one vreg each).
            return (a0 + dd[0:8, :], a1 + dd[8:16, :],
                    a2 + dd[16:24, :], a3 + dd[24:32, :])

        zero = jnp.zeros((8, _LANES), jnp.float32)
        a0, a1, a2, a3 = lax.fori_loop(
            0, chunks, chunk_body, (zero, zero, zero, zero),
            unroll=min(8, chunks))
        o_ref[...] += (a0 + a1) + (a2 + a3)

        # Fold the 1/N scaling into the epilogue of the reduction.
        @pl.when(i == bpc - 1)
        def _():
            o_ref[...] = o_ref[...] * inv_n

    return kernel


def loss_mse_forward(x, prediction, *, tile_rows=None, num_cores=None,
                     vmem_limit_bytes=None):
    """Pallas implementation of LossMSE.forward.

    x          : (N, ...) array (the "input" argument of the torch module)
    prediction : any array with N elements; reshaped to (N, 1) like the module
    returns    : scalar f32 loss = (1/N) * sum((x - prediction)**2)
    """
    n = x.shape[0]
    p = jnp.reshape(prediction, (n, 1))   # torch.reshape(prediction, (len(input), 1))

    if x.ndim >= 2 and x.size == n:
        # Common case: input is (N,1[,1...]) -> elementwise difference; the
        # flatten is a free layout reinterpretation, no broadcast needed.
        xf = jnp.reshape(x, (n,))
        pf = jnp.reshape(p, (n,))
    else:
        # General torch broadcasting of input.sub(prediction) (note: a 1-D
        # (N,) input broadcasts to (N,N), faithfully matching torch).
        # TODO(synk): for wide (N,D) inputs, stream prediction through its own
        # (tile,1) BlockSpec and broadcast in-kernel instead of materializing.
        bshape = jnp.broadcast_shapes(x.shape, (n, 1))
        pb = jnp.reshape(p, (n,) + (1,) * (len(bshape) - 1))
        xf = jnp.broadcast_to(x, bshape).reshape(-1)
        pf = jnp.broadcast_to(pb, bshape).reshape(-1)

    # Keep f32 / bf16 / fp16 native in HBM (kernel upcasts per chunk);
    # anything else is cast to f32 here.
    if xf.dtype.name not in _NATIVE_DTYPES:
        xf = xf.astype(jnp.float32)
    if pf.dtype.name not in _NATIVE_DTYPES:
        pf = pf.astype(jnp.float32)

    det_cores, det_tile, det_vmem = _tpu_config()
    num_cores = det_cores if num_cores is None else num_cores
    tile_rows = det_tile if tile_rows is None else tile_rows
    vmem_limit_bytes = det_vmem if vmem_limit_bytes is None else vmem_limit_bytes

    total = xf.size
    inv_n = 1.0 / n

    # Minimal zero-padding: only up to the next 4096-element (32x128) boundary
    # (a zero diff adds nothing to the sum).  When `total` is already aligned
    # this is a pure reshape -- no extra HBM pass over the data.
    padded_total = max(_round_up(total, _ALIGN_ELEMS), _ALIGN_ELEMS)
    pad = padded_total - total
    if pad:
        xf = jnp.pad(xf, (0, pad))
        pf = jnp.pad(pf, (0, pad))
    rows = padded_total // _LANES

    tile_rows = max(_CHUNK_ROWS,
                    (min(tile_rows, rows) // _CHUNK_ROWS) * _CHUNK_ROWS)
    nblocks = pl.cdiv(rows, tile_rows)
    bpc = pl.cdiv(nblocks, num_cores)
    # Mask needed whenever (num_cores x bpc) block coverage exceeds the real
    # rows (partial last block and/or surplus per-core blocks).
    needs_mask = (num_cores * bpc * tile_rows) != rows

    def in_map(c, i):
        # Clamp surplus blocks onto the last real block; they are fully masked
        # in the kernel, so re-reading valid data is harmless.
        return (jnp.minimum(c * bpc + i, nblocks - 1), 0)

    x2d = xf.reshape(rows, _LANES)
    p2d = pf.reshape(rows, _LANES)

    kernel = _make_mse_kernel(tile_rows, rows, bpc, inv_n, needs_mask)

    partials = pl.pallas_call(
        kernel,
        out_shape=jax.ShapeDtypeStruct((num_cores * 8, _LANES), jnp.float32),
        grid_spec=pltpu.PrefetchScalarGridSpec(
            num_scalar_prefetch=0,
            grid=(num_cores, bpc),
            in_specs=[
                pl.BlockSpec((tile_rows, _LANES), in_map),
                pl.BlockSpec((tile_rows, _LANES), in_map),
            ],
            out_specs=pl.BlockSpec((8, _LANES), lambda c, i: (c, 0)),
        ),
        compiler_params=pltpu.CompilerParams(
            # TODO(synk): on v7x, verify the "parallel" leading axis really
            # shards across both TensorCores; if not, switch to CORE_PARALLEL.
            dimension_semantics=("parallel", "arbitrary"),
            vmem_limit_bytes=vmem_limit_bytes,
        ),
    )(x2d, p2d)

    # Tiny final reduce of the (already 1/N-scaled) per-core (8,128) partials.
    return jnp.sum(partials)


if __name__ == "__main__":
    key = jax.random.PRNGKey(0)
    k1, k2, k3, k4, k5, k6, k7, k8 = jax.random.split(key, 8)

    # 1) Aligned fast path: (N,1) f32 input, (N,) prediction, N % 4096 == 0
    #    -> zero wrapper-side copies (reshape only).
    N1 = 4096
    x1 = jax.random.normal(k1, (N1, 1), dtype=jnp.float32)
    p1 = jax.random.normal(k2, (N1,), dtype=jnp.float32)
    out1 = jax.block_until_ready(loss_mse_forward(x1, p1))
    ref1 = jnp.sum(jnp.square(x1 - jnp.reshape(p1, (N1, 1)))) / N1
    assert jnp.allclose(out1, ref1, rtol=1e-5, atol=1e-6), (out1, ref1)

    # 2) Ragged N with a tiny forced tile and a forced 2-long "parallel" axis:
    #    exercises minimal tail padding, partial-block masking and surplus
    #    block clamping (safe on single-core chips, where it is a serial loop).
    N2 = 20000
    x2 = jax.random.normal(k3, (N2, 1), dtype=jnp.float32)
    p2 = jax.random.normal(k4, (N2,), dtype=jnp.float32)
    out2 = jax.block_until_ready(
        loss_mse_forward(x2, p2, tile_rows=64, num_cores=2))
    ref2 = jnp.sum(jnp.square(x2 - jnp.reshape(p2, (N2, 1)))) / N2
    assert jnp.allclose(out2, ref2, rtol=1e-5, atol=1e-6), (out2, ref2)

    # 3) bf16 inputs stay native in HBM; the kernel upcasts per 32-row chunk.
    N3 = 4096
    x3 = jax.random.normal(k5, (N3, 1), dtype=jnp.float32).astype(jnp.bfloat16)
    p3 = jax.random.normal(k6, (N3,), dtype=jnp.float32).astype(jnp.bfloat16)
    out3 = jax.block_until_ready(loss_mse_forward(x3, p3))
    ref3 = jnp.sum(jnp.square(x3.astype(jnp.float32)
                              - jnp.reshape(p3, (N3, 1)).astype(jnp.float32))) / N3
    assert jnp.allclose(out3, ref3, rtol=1e-4, atol=1e-4), (out3, ref3)

    # 4) Multi-column input: faithful torch broadcasting of (N,D) - (N,1).
    N4, D4 = 8, 4
    x4 = jax.random.normal(k7, (N4, D4), dtype=jnp.float32)
    p4 = jax.random.normal(k8, (N4,), dtype=jnp.float32)
    out4 = jax.block_until_ready(loss_mse_forward(x4, p4))
    ref4 = jnp.sum(jnp.square(x4 - jnp.reshape(p4, (N4, 1)))) / N4
    assert jnp.allclose(out4, ref4, rtol=1e-5, atol=1e-6), (out4, ref4)

    print("KERNEL_OK")
</pallas_src>

<mosaic_0001>
module attributes {stable_mosaic.version = 11 : i64} {
  func.func @kernel(%arg0: i32, %arg1: i32, %arg2: memref<32x128xf32, #tpu.memory_space<vmem>>, %arg3: memref<32x128xf32, #tpu.memory_space<vmem>>, %arg4: memref<8x128xf32, #tpu.memory_space<vmem>>) attributes {dimension_semantics = [#tpu.dimension_semantics<parallel>, #tpu.dimension_semantics<arbitrary>], iteration_bounds = array<i64: 1, 1>, scalar_prefetch = 0 : i64, scratch_operands = 0 : i64, tpu.core_type = #tpu.core_type<tc>, window_params = [{transform_indices = @transform_0, window_bounds = array<i64: 32, 128>}, {transform_indices = @transform_1, window_bounds = array<i64: 32, 128>}, {transform_indices = @transform_2, window_bounds = array<i64: 8, 128>}]} {
    %c0_i32 = arith.constant 0 : i32
    %0 = arith.cmpi eq, %arg1, %c0_i32 : i32
    %1 = arith.extui %0 : i1 to i32
    %c0_i32_0 = arith.constant 0 : i32
    %2 = arith.cmpi ne, %1, %c0_i32_0 : i32
    scf.if %2 {
      %cst_9 = arith.constant 0.000000e+00 : f32
      %29 = vector.broadcast %cst_9 : f32 to vector<8x128xf32>
      %c0_10 = arith.constant 0 : index
      %c0_11 = arith.constant 0 : index
      %30 = vector.load %arg4[%c0_10, %c0_11] : memref<8x128xf32, #tpu.memory_space<vmem>>, vector<8x128xf32>
      tpu.vector_store %arg4[%c0_10, %c0_11], %29 {strides = array<i32>} : memref<8x128xf32, #tpu.memory_space<vmem>>, vector<8x128xf32>,
    } else {
    }
    %cst = arith.constant 0.000000e+00 : f32
    %3 = vector.broadcast %cst : f32 to vector<8x128xf32>
    %c0_i32_1 = arith.constant 0 : i32
    %c32_i32 = arith.constant 32 : i32
    %4 = arith.muli %c0_i32_1, %c32_i32 : i32
    %5 = tpu.assume_multiple %4, 32 : i32
    %6 = arith.index_cast %5 : i32 to index
    %c0 = arith.constant 0 : index
    %7 = vector.load %arg2[%6, %c0] : memref<32x128xf32, #tpu.memory_space<vmem>>, vector<32x128xf32>
    %8 = arith.index_cast %5 : i32 to index
    %c0_2 = arith.constant 0 : index
    %9 = vector.load %arg3[%8, %c0_2] : memref<32x128xf32, #tpu.memory_space<vmem>>, vector<32x128xf32>
    %10 = arith.subf %7, %9 : vector<32x128xf32>
    %11 = arith.mulf %10, %10 : vector<32x128xf32>
    %12 = vector.extract_strided_slice %11 {offsets = [0, 0], sizes = [8, 128], strides = [1, 1]} : vector<32x128xf32> to vector<8x128xf32>
    %13 = arith.addf %3, %12 : vector<8x128xf32>
    %14 = vector.extract_strided_slice %11 {offsets = [8, 0], sizes = [8, 128], strides = [1, 1]} : vector<32x128xf32> to vector<8x128xf32>
    %15 = arith.addf %3, %14 : vector<8x128xf32>
    %16 = vector.extract_strided_slice %11 {offsets = [16, 0], sizes = [8, 128], strides = [1, 1]} : vector<32x128xf32> to vector<8x128xf32>
    %17 = arith.addf %3, %16 : vector<8x128xf32>
    %18 = vector.extract_strided_slice %11 {offsets = [24, 0], sizes = [8, 128], strides = [1, 1]} : vector<32x128xf32> to vector<8x128xf32>
    %19 = arith.addf %3, %18 : vector<8x128xf32>
    %c1_i32 = arith.constant 1 : i32
    %c0_3 = arith.constant 0 : index
    %c0_4 = arith.constant 0 : index
    %20 = vector.load %arg4[%c0_3, %c0_4] : memref<8x128xf32, #tpu.memory_space<vmem>>, vector<8x128xf32>
    %21 = arith.addf %13, %15 : vector<8x128xf32>
    %22 = arith.addf %17, %19 : vector<8x128xf32>
    %23 = arith.addf %21, %22 : vector<8x128xf32>
    %24 = arith.addf %20, %23 : vector<8x128xf32>
    %c0_5 = arith.constant 0 : index
    %c0_6 = arith.constant 0 : index
    %25 = vector.load %arg4[%c0_5, %c0_6] : memref<8x128xf32, #tpu.memory_space<vmem>>, vector<8x128xf32>
    tpu.vector_store %arg4[%c0_5, %c0_6], %24 {strides = array<i32>} : memref<8x128xf32, #tpu.memory_space<vmem>>, vector<8x128xf32>,
    %c0_i32_7 = arith.constant 0 : i32
    %26 = arith.cmpi eq, %arg1, %c0_i32_7 : i32
    %27 = arith.extui %26 : i1 to i32
    %c0_i32_8 = arith.constant 0 : i32
    %28 = arith.cmpi ne, %27, %c0_i32_8 : i32
    scf.if %28 {
      %c0_9 = arith.constant 0 : index
      %c0_10 = arith.constant 0 : index
      %29 = vector.load %arg4[%c0_9, %c0_10] : memref<8x128xf32, #tpu.memory_space<vmem>>, vector<8x128xf32>
      %cst_11 = arith.constant 2.44140625E-4 : f32
      %30 = vector.broadcast %cst_11 : f32 to vector<8x128xf32>
      %31 = arith.mulf %29, %30 : vector<8x128xf32>
      %c0_12 = arith.constant 0 : index
      %c0_13 = arith.constant 0 : index
      %32 = vector.load %arg4[%c0_12, %c0_13] : memref<8x128xf32, #tpu.memory_space<vmem>>, vector<8x128xf32>
      tpu.vector_store %arg4[%c0_12, %c0_13], %31 {strides = array<i32>} : memref<8x128xf32, #tpu.memory_space<vmem>>, vector<8x128xf32>,
    } else {
    }
    return
  }
  func.func @transform_0(%arg0: i32, %arg1: i32) -> (i32, i32) {
    %c1_i32 = arith.constant 1 : i32
    %0 = arith.muli %arg0, %c1_i32 : i32
    %1 = arith.addi %0, %arg1 : i32
    %c0_i32 = arith.constant 0 : i32
    %2 = arith.minsi %1, %c0_i32 : i32
    %c0_i32_0 = arith.constant 0 : i32
    %c0_i32_1 = arith.constant 0 : i32
    return %2, %c0_i32_0 : i32, i32
  }
  func.func @transform_1(%arg0: i32, %arg1: i32) -> (i32, i32) {
    %c1_i32 = arith.constant 1 : i32
    %0 = arith.muli %arg0, %c1_i32 : i32
    %1 = arith.addi %0, %arg1 : i32
    %c0_i32 = arith.constant 0 : i32
    %2 = arith.minsi %1, %c0_i32 : i32
    %c0_i32_0 = arith.constant 0 : i32
    %c0_i32_1 = arith.constant 0 : i32
    return %2, %c0_i32_0 : i32, i32
  }
  func.func @transform_2(%arg0: i32, %arg1: i32) -> (i32, i32) {
    %c0_i32 = arith.constant 0 : i32
    %c0_i32_0 = arith.constant 0 : i32
    return %arg0, %c0_i32 : i32, i32
  }
}

</mosaic_0001>

<bundles_post_ra>
// kernel: tpu_custom_call.1
= control target key start
LH: loop header
LB: loop body
LE: loop exit
PB: predicated region body
PF: predicated region fallthrough
CT: control target
= control target key end

     0   :  { %7 = vsyncpa [#allocation3], 0  ;;  %s236_s0 = inlined_call_operand.hbm [shape: f32[32,128], index: 0, kind: input, shape index: {}]   ;;  %s237_s1 = inlined_call_operand.hbm [shape: f32[32,128], index: 1, kind: input, shape index: {}]   ;;  %s238_s2 = inlined_call_operand.hbm [shape: f32[8,128], index: 2, kind: output, shape index: {}]  }
   0x1   :  { %8 = vsyncpa [#allocation6], 0 }
   0x2   :  { %9 = vsyncpa [#allocation4], 0  ;;  %s20_s11 = sshll.u32 %s236_s0, 4  ;;  %s207_s12 = smov [#allocation2]   ;;  %s21_s11 = int_to_ptr.hbm [resolvable:$true] %s20_s11 }
   0x3   :  { %s22_s13 = sshll.u32 %s207_s12, 4  ;;  %s39_s16 = sshll.u32 %s237_s1, 4  ;;  %s23_s13 = int_to_ptr.vmem [resolvable:$true] %s22_s13  ;;  %s40_s16 = int_to_ptr.hbm [resolvable:$true] %s39_s16 }
   0x4   :  { %s208_s17 = smov 128   ;;  %s209_s18 = smov 8  }
   0x5   :  { %28 = dma.hbm_to_vmem [thread:$0]  %s21_s11, 512, %s23_s13, [#allocation3], %s208_s17, %s208_s17, %s209_s18  }
   0x6   :  { %s210_s19 = smov [#allocation5]  }
   0x7   :  { %s41_s20 = sshll.u32 %s210_s19, 4  ;;  %s42_s20 = int_to_ptr.vmem [resolvable:$true] %s41_s20 }
   0x8   :  { %47 = dma.hbm_to_vmem [thread:$0]  %s40_s16, 512, %s42_s20, [#allocation6], %s208_s17, %s208_s17, %s209_s18  }
   0x9   :  { %201 = dma.done.wait [#allocation3], 512  }
   0xa   :  { %202 = vsyncadd [#allocation3], 4294966784 }
   0xb   :  { %203 = dma.done.wait [#allocation6], 512  }
   0xc   :  { %204 = vsyncadd [#allocation6], 4294966784  ;;  %v69_v0 = vld [vmem:[#allocation2] sm:$0xff]  ;;  %v70_v1 = vld [vmem:[#allocation2 + $0x8] sm:$0xff]  ;;  %s211_s0 = smov [#allocation7]   ;;  %s108_s23 = sshll.u32 %s238_s2, 4  ;;  %s109_s23 = int_to_ptr.hbm [resolvable:$true] %s108_s23 }
   0xd   :  { %v71_v2 = vld [vmem:[#allocation2 + $0x10] sm:$0xff]  ;;  %v72_v3 = vld [vmem:[#allocation2 + $0x18] sm:$0xff]  ;;  %v73_v4 = vld [vmem:[#allocation5] sm:$0xff]  ;;  %s106_s1 = sshll.u32 %s211_s0, 4  ;;  %s107_s1 = int_to_ptr.vmem [resolvable:$true] %s106_s1 }
   0xe   :  { %v74_v5 = vld [vmem:[#allocation5 + $0x8] sm:$0xff]  ;;  %v75_v6 = vld [vmem:[#allocation5 + $0x10] sm:$0xff]  ;;  %v76_v7 = vld [vmem:[#allocation5 + $0x18] sm:$0xff]  ;;  %v77_v8 = vsub.f32 %v69_v0, %v73_v4 }
   0xf   :  { %v78_v9 = vsub.f32 %v70_v1, %v74_v5  ;;  %v79_v10 = vsub.f32 %v71_v2, %v75_v6  ;;  %v80_v11 = vsub.f32 %v72_v3, %v76_v7 }
  0x10   :  { %v81_v12 = vmul.f32 %v77_v8, %v77_v8 }
  0x11   :  { %v82_v13 = vmul.f32 %v78_v9, %v78_v9  ;;  %v83_v14 = vmul.f32 %v79_v10, %v79_v10  ;;  %v84_v15 = vmul.f32 %v80_v11, %v80_v11 }
  0x13   :  { %v90_v16 = vadd.f32 %v82_v13, %v81_v12  ;;  %v91_v17 = vadd.f32 %v84_v15, %v83_v14 }
  0x15   :  { %v92_v18 = vadd.f32 %v91_v17, %v90_v16 }
  0x17   :  { %v99_v19 = vmul.f32 0.00024414063, %v92_v18 }
  0x19   :  { %100 = vst [vmem:[#allocation7] sm:$0xff] %v99_v19 }
  0x1a   :  { %111 = dma.vmem_to_hbm [thread:$0]  %s107_s1, 128, %s109_s23, [#allocation4]  }
  0x1b   :  { %205 = dma.done.wait [#allocation4], 128  }
  0x1c   :  { %206 = vsyncadd [#allocation4], 4294967168 }
  0x1d   :  { %116 = vsyncpa [#allocation3], 1 }
  0x1e   :  { %117 = vsyncpa [#allocation6], 1 }
  0x1f   :  { %118 = vsyncpa [#allocation4], 1 }

</bundles_post_ra>
